<compile_context>
chip_gen: v7x
topology: tpu7x:2x2x1
jax: 0.10.0
libtpu: 0.0.40
codegen_flags: <defaults>
</compile_context>

<pallas_src>
import functools

import jax
import jax.numpy as jnp
import numpy as np
from jax import lax
from jax.experimental import pallas as pl
from jax.experimental.pallas import tpu as pltpu

VMEM_SPEC = pl.BlockSpec(memory_space=pltpu.MemorySpace.VMEM)

# dot_general dimension_numbers
_SCATTER_DN = (((0,), (0,)), ((), ()))   # (K, N), (K, H) -> (N, H)   ==  N^T-scatter (contract K)


# ----------------------------------------------------------------------------
# One fused kernel for the whole Hypergraph forward pass.
# ----------------------------------------------------------------------------
def _fused_forward_kernel(
    v_in_ref, e_in_ref,                    # raw vertex / edge features
    vtx_w_ref, vtx_b_ref,                  # vtx_lin
    wv2e_ref, bv_ref, we2v_ref, be_ref,    # stacked (L,H,H) / (L,H) HyperMod params
    p_ref, g_ref,                          # one-hot incidence matrices (K,nv), (K,ne)
    vrw_ref, erw_ref,                      # prescaled reg weights (K,1)
    vrs_inv_ref, ers_inv_ref,              # reciprocals of reg sums (nv,1), (ne,1)
    cls_w_ref, cls_b_ref,                  # cls linear, padded to 128 output lanes
    v_out_ref, e_out_ref, pred_ref,
    *, n_layers, v_weight, v_fac, edge_linear,
):
    f32 = jnp.float32

    # v = self.vtx_lin(v)
    v = jnp.dot(v_in_ref[...], vtx_w_ref[...], preferred_element_type=f32) + vtx_b_ref[...]
    e = e_in_ref[...]

    p = p_ref[...]                 # (K, nv)
    g = g_ref[...]                 # (K, ne)
    vrw = vrw_ref[...]             # v_weight * v_reg_weight[idx]     (K, 1)
    erw = erw_ref[...]             # e_weight * e_reg_weight[idx]     (K, 1)
    vrs_inv = vrs_inv_ref[...]     # 1 / v_reg_sum                    (nv, 1)
    ers_inv = ers_inv_ref[...]     # 1 / e_reg_sum                    (ne, 1)
    v_scale = v_weight * v_fac     # static python float

    for i in range(n_layers):      # unrolled: n_layers is static
        w_v2e = wv2e_ref[i]                      # (H, H)
        b_v = bv_ref[pl.ds(i, 1), :]             # (1, H)
        w_e2v = we2v_ref[i]                      # (H, H)
        b_e = be_ref[pl.ds(i, 1), :]             # (1, H)

        # vertex -> edge messages
        ve = jnp.dot(v, w_v2e, preferred_element_type=f32) + b_v
        if not edge_linear:
            ve = jnp.maximum(ve, 0.0)
        # (ve * v_weight)[player_idx] * v_reg_weight[idx]  ==  (P @ ve) * vrw
        ve_g = jnp.dot(p, ve, preferred_element_type=f32) * vrw                   # (K, H)
        # e.scatter_add_(src=ve_g, index=game_idx) ; e /= e_reg_sum
        e = (e + lax.dot_general(g, ve_g, _SCATTER_DN, preferred_element_type=f32)) * ers_inv

        # edge -> vertex messages
        ev = jnp.maximum(jnp.dot(e, w_e2v, preferred_element_type=f32) + b_e, 0.0)
        # (ev * e_weight)[game_idx] * e_reg_weight[idx]  ==  (G @ ev) * erw
        ev_g = jnp.dot(g, ev, preferred_element_type=f32) * erw                   # (K, H)
        # v = v*v_weight*v_fac ; v.scatter_add_(src=ev_g, index=player_idx) ; v /= v_reg_sum
        v = (v * v_scale
             + lax.dot_general(p, ev_g, _SCATTER_DN, preferred_element_type=f32)) * vrs_inv
        # TODO(synk): F.dropout with dropout_p > 0 would need in-kernel RNG
        # (pltpu.prng_seed / pltpu.stateful_bernoulli); this config uses dropout_p = 0 (identity).

    # last-layer gathers:  v = v[player_idx], e = e[game_idx]
    v_f = jnp.dot(p, v, preferred_element_type=f32)        # (K, H)
    e_f = jnp.dot(g, e, preferred_element_type=f32)        # (K, H)
    # pred = self.cls(v)   (weights pre-padded so the store is 128-lane dense)
    pred = jnp.dot(v_f, cls_w_ref[...], preferred_element_type=f32) + cls_b_ref[...]

    v_out_ref[...] = v_f
    e_out_ref[...] = e_f
    pred_ref[...] = pred


# ----------------------------------------------------------------------------
# Jitted wrapper (index glue built once, single pallas_call).
# ----------------------------------------------------------------------------
def make_hypergraph_forward(cfg):
    nv, ne = cfg["nv"], cfg["ne"]
    n_hidden = cfg["n_hidden"]
    n_cls = cfg["n_cls"]
    n_layers = cfg["n_layers"]
    v_fac = 4.0 if cfg["predict_edge"] else 1.0
    cls_pad = ((n_cls + 127) // 128) * 128        # lane-dense width for the pred store

    kern = functools.partial(
        _fused_forward_kernel,
        n_layers=n_layers,
        v_weight=float(cfg["v_weight"]),
        v_fac=float(v_fac),
        edge_linear=bool(cfg["edge_linear"]),
    )

    @jax.jit
    def forward(params, reg, v_in, e_in, player_idx, game_idx, idx):
        k = player_idx.shape[0]

        # Index glue, built once per call (fused layer loop -> trivially hoisted).
        p = jax.nn.one_hot(player_idx, nv, dtype=jnp.float32)        # (K, nv)
        g = jax.nn.one_hot(game_idx, ne, dtype=jnp.float32)          # (K, ne)
        vrw = cfg["v_weight"] * reg["v_reg_weight"][idx]             # (K, 1)
        erw = cfg["e_weight"] * reg["e_reg_weight"][idx]             # (K, 1)
        vrs_inv = 1.0 / reg["v_reg_sum"]                             # (nv, 1)
        ers_inv = 1.0 / reg["e_reg_sum"]                             # (ne, 1)

        e0 = e_in
        if cfg["predict_edge"]:
            # Only used when predict_edge=True (not this config): plain XLA projection.
            e0 = e_in @ params["edge_lin_w"] + params["edge_lin_b"]
        # TODO(synk): use_edge_lin=True last-layer edge_lin/concat branch not implemented
        # (config uses use_edge_lin=False).

        cls_w = jnp.zeros((n_hidden, cls_pad), jnp.float32).at[:, :n_cls].set(params["cls_w"])
        cls_b = jnp.zeros((1, cls_pad), jnp.float32).at[:, :n_cls].set(params["cls_b"])

        v_out, e_out, pred_pad = pl.pallas_call(
            kern,
            out_shape=(
                jax.ShapeDtypeStruct((k, n_hidden), jnp.float32),
                jax.ShapeDtypeStruct((k, n_hidden), jnp.float32),
                jax.ShapeDtypeStruct((k, cls_pad), jnp.float32),
            ),
            in_specs=[VMEM_SPEC] * 16,
            out_specs=(VMEM_SPEC, VMEM_SPEC, VMEM_SPEC),
        )(
            v_in, e0,
            params["vtx_lin_w"], params["vtx_lin_b"].reshape(1, n_hidden),
            params["W_v2e"], params["b_v"],
            params["W_e2v"], params["b_e"],
            p, g, vrw, erw, vrs_inv, ers_inv,
            cls_w, cls_b,
        )
        return v_out, e_out, pred_pad[:, :n_cls]

    return forward


# ----------------------------------------------------------------------------
# float64 numpy reference of the PyTorch forward (for a direct numeric diff).
# ----------------------------------------------------------------------------
def _reference_forward_np(params, cfg, reg, v_in, e_in, player_idx, game_idx, idx):
    def relu(x):
        return np.maximum(x, 0.0)

    f64 = lambda a: np.asarray(a, dtype=np.float64)
    v = f64(v_in) @ f64(params["vtx_lin_w"]) + f64(params["vtx_lin_b"])
    e = f64(e_in).copy()
    if cfg["predict_edge"]:
        e = f64(e_in) @ f64(params["edge_lin_w"]) + f64(params["edge_lin_b"])

    v_weight, e_weight = cfg["v_weight"], cfg["e_weight"]
    v_fac = 4.0 if cfg["predict_edge"] else 1.0
    v_reg_weight, e_reg_weight = f64(reg["v_reg_weight"]), f64(reg["e_reg_weight"])
    v_reg_sum, e_reg_sum = f64(reg["v_reg_sum"]), f64(reg["e_reg_sum"])
    pidx, gidx, iidx = np.asarray(player_idx), np.asarray(game_idx), np.asarray(idx)

    for li in range(cfg["n_layers"]):
        is_last = li == cfg["n_layers"] - 1
        W_v2e, b_v = f64(params["W_v2e"][li]), f64(params["b_v"][li])
        W_e2v, b_e = f64(params["W_e2v"][li]), f64(params["b_e"][li])

        ve = v @ W_v2e + b_v
        if not cfg["edge_linear"]:
            ve = relu(ve)
        v = v * v_weight * v_fac
        ve_g = (ve * v_weight)[pidx] * v_reg_weight[iidx]
        e = e.copy()
        np.add.at(e, gidx, ve_g)
        e = e / e_reg_sum
        ev = relu(e @ W_e2v + b_e)
        ev_g = (ev * e_weight)[gidx] * e_reg_weight[iidx]
        np.add.at(v, pidx, ev_g)
        v = v / v_reg_sum
        if is_last:
            v = v[pidx]
            e = e[gidx]

    pred = v @ f64(params["cls_w"]) + f64(params["cls_b"])
    return v, e, pred


# ----------------------------------------------------------------------------
# Deterministic setup + run
# ----------------------------------------------------------------------------
if __name__ == "__main__":
    key = jax.random.PRNGKey(0)
    ks = jax.random.split(key, 20)

    NV, NE, K = 16, 8, 24          # vertices, hyperedges, incidence pairs
    INPUT_DIM, N_HIDDEN, N_CLS = 16, 32, 4
    N_LAYERS = 2

    cfg = dict(
        nv=NV, ne=NE, n_hidden=N_HIDDEN, input_dim=INPUT_DIM, n_cls=N_CLS,
        n_layers=N_LAYERS,
        v_weight=0.5, e_weight=0.7,
        predict_edge=False, edge_linear=False, use_edge_lin=False,
        dropout_p=0.0,
    )
    # Regularization tensors; sums strictly positive (the model divides by them).
    reg = dict(
        v_reg_weight=jax.random.uniform(ks[0], (K, 1), jnp.float32, 0.5, 1.5),
        e_reg_weight=jax.random.uniform(ks[1], (K, 1), jnp.float32, 0.5, 1.5),
        v_reg_sum=jax.random.uniform(ks[2], (NV, 1), jnp.float32, 1.0, 3.0),
        e_reg_sum=jax.random.uniform(ks[3], (NE, 1), jnp.float32, 1.0, 3.0),
    )
    # Parameters (torch.Linear weights stored pre-transposed as (in, out);
    # per-layer HyperMod params stacked on a leading layer axis).
    params = dict(
        vtx_lin_w=0.1 * jax.random.normal(ks[4], (INPUT_DIM, N_HIDDEN), jnp.float32),
        vtx_lin_b=0.1 * jax.random.normal(ks[5], (N_HIDDEN,), jnp.float32),
        W_v2e=0.25 * jax.random.normal(ks[6], (N_LAYERS, N_HIDDEN, N_HIDDEN), jnp.float32),
        b_v=0.1 * jax.random.normal(ks[7], (N_LAYERS, N_HIDDEN), jnp.float32),
        W_e2v=0.25 * jax.random.normal(ks[8], (N_LAYERS, N_HIDDEN, N_HIDDEN), jnp.float32),
        b_e=0.1 * jax.random.normal(ks[9], (N_LAYERS, N_HIDDEN), jnp.float32),
        cls_w=0.1 * jax.random.normal(ks[10], (N_HIDDEN, N_CLS), jnp.float32),
        cls_b=0.1 * jax.random.normal(ks[11], (N_CLS,), jnp.float32),
    )

    # Inputs (predict_edge=False, so e is consumed at n_hidden width directly).
    v_in = jax.random.normal(ks[12], (NV, INPUT_DIM), jnp.float32)
    e_in = jax.random.normal(ks[13], (NE, N_HIDDEN), jnp.float32)
    player_idx = jax.random.randint(ks[14], (K,), 0, NV, jnp.int32)
    game_idx = jax.random.randint(ks[15], (K,), 0, NE, jnp.int32)
    idx = jnp.arange(K, dtype=jnp.int32)

    forward = make_hypergraph_forward(cfg)
    v_out, e_out, pred = forward(params, reg, v_in, e_in, player_idx, game_idx, idx)
    jax.block_until_ready((v_out, e_out, pred))

    assert v_out.shape == (K, N_HIDDEN)
    assert e_out.shape == (K, N_HIDDEN)
    assert pred.shape == (K, N_CLS)

    # Direct numeric diff against a float64 numpy port of the PyTorch forward.
    v_ref, e_ref, pred_ref_np = _reference_forward_np(
        params, cfg, reg, v_in, e_in, player_idx, game_idx, idx)
    assert np.allclose(np.asarray(v_out), v_ref, rtol=5e-2, atol=5e-2)
    assert np.allclose(np.asarray(e_out), e_ref, rtol=5e-2, atol=5e-2)
    assert np.allclose(np.asarray(pred), pred_ref_np, rtol=5e-2, atol=5e-2)

    print("KERNEL_OK")
</pallas_src>

<mosaic_0001>
module attributes {stable_mosaic.version = 11 : i64} {
  func.func @_fused_forward_kernel(%arg0: memref<16x16xf32, #tpu.memory_space<vmem>>, %arg1: memref<8x32xf32, #tpu.memory_space<vmem>>, %arg2: memref<16x32xf32, #tpu.memory_space<vmem>>, %arg3: memref<1x32xf32, #tpu.memory_space<vmem>>, %arg4: memref<2x32x32xf32, #tpu.memory_space<vmem>>, %arg5: memref<2x32xf32, #tpu.memory_space<vmem>>, %arg6: memref<2x32x32xf32, #tpu.memory_space<vmem>>, %arg7: memref<2x32xf32, #tpu.memory_space<vmem>>, %arg8: memref<24x16xf32, #tpu.memory_space<vmem>>, %arg9: memref<24x8xf32, #tpu.memory_space<vmem>>, %arg10: memref<24x1xf32, #tpu.memory_space<vmem>>, %arg11: memref<24x1xf32, #tpu.memory_space<vmem>>, %arg12: memref<16x1xf32, #tpu.memory_space<vmem>>, %arg13: memref<8x1xf32, #tpu.memory_space<vmem>>, %arg14: memref<32x128xf32, #tpu.memory_space<vmem>>, %arg15: memref<1x128xf32, #tpu.memory_space<vmem>>, %arg16: memref<24x32xf32, #tpu.memory_space<vmem>>, %arg17: memref<24x32xf32, #tpu.memory_space<vmem>>, %arg18: memref<24x128xf32, #tpu.memory_space<vmem>>) attributes {dimension_semantics = [], scalar_prefetch = 0 : i64, scratch_operands = 0 : i64, tpu.core_type = #tpu.core_type<tc>} {
    %c0 = arith.constant 0 : index
    %c0_0 = arith.constant 0 : index
    %0 = vector.load %arg0[%c0, %c0_0] : memref<16x16xf32, #tpu.memory_space<vmem>>, vector<16x16xf32>
    %c0_1 = arith.constant 0 : index
    %c0_2 = arith.constant 0 : index
    %1 = vector.load %arg2[%c0_1, %c0_2] : memref<16x32xf32, #tpu.memory_space<vmem>>, vector<16x32xf32>
    %cst = arith.constant dense<0.000000e+00> : vector<16x32xf32>
    %2 = tpu.matmul %0, %1, %cst {dimension_numbers = #tpu.dot_dimension_numbers<[1], [0], [0], [1], [0, 0, 1, 1], [], []>} : vector<16x16xf32>, vector<16x32xf32>, vector<16x32xf32> -> vector<16x32xf32>
    %c0_3 = arith.constant 0 : index
    %c0_4 = arith.constant 0 : index
    %3 = vector.load %arg3[%c0_3, %c0_4] : memref<1x32xf32, #tpu.memory_space<vmem>>, vector<1x32xf32>
    %4 = vector.broadcast %3 : vector<1x32xf32> to vector<16x32xf32>
    %5 = arith.addf %2, %4 : vector<16x32xf32>
    %c0_5 = arith.constant 0 : index
    %c0_6 = arith.constant 0 : index
    %6 = vector.load %arg1[%c0_5, %c0_6] : memref<8x32xf32, #tpu.memory_space<vmem>>, vector<8x32xf32>
    %c0_7 = arith.constant 0 : index
    %c0_8 = arith.constant 0 : index
    %7 = vector.load %arg8[%c0_7, %c0_8] : memref<24x16xf32, #tpu.memory_space<vmem>>, vector<24x16xf32>
    %c0_9 = arith.constant 0 : index
    %c0_10 = arith.constant 0 : index
    %8 = vector.load %arg9[%c0_9, %c0_10] : memref<24x8xf32, #tpu.memory_space<vmem>>, vector<24x8xf32>
    %c0_11 = arith.constant 0 : index
    %c0_12 = arith.constant 0 : index
    %9 = vector.load %arg10[%c0_11, %c0_12] : memref<24x1xf32, #tpu.memory_space<vmem>>, vector<24x1xf32>
    %c0_13 = arith.constant 0 : index
    %c0_14 = arith.constant 0 : index
    %10 = vector.load %arg11[%c0_13, %c0_14] : memref<24x1xf32, #tpu.memory_space<vmem>>, vector<24x1xf32>
    %c0_15 = arith.constant 0 : index
    %c0_16 = arith.constant 0 : index
    %11 = vector.load %arg12[%c0_15, %c0_16] : memref<16x1xf32, #tpu.memory_space<vmem>>, vector<16x1xf32>
    %c0_17 = arith.constant 0 : index
    %c0_18 = arith.constant 0 : index
    %12 = vector.load %arg13[%c0_17, %c0_18] : memref<8x1xf32, #tpu.memory_space<vmem>>, vector<8x1xf32>
    %c0_19 = arith.constant 0 : index
    %c0_20 = arith.constant 0 : index
    %c0_21 = arith.constant 0 : index
    %13 = vector.load %arg4[%c0_19, %c0_20, %c0_21] : memref<2x32x32xf32, #tpu.memory_space<vmem>>, vector<1x32x32xf32>
    %14 = vector.shape_cast %13 : vector<1x32x32xf32> to vector<32x32xf32>
    %c0_22 = arith.constant 0 : index
    %c0_23 = arith.constant 0 : index
    %15 = vector.load %arg5[%c0_22, %c0_23] : memref<2x32xf32, #tpu.memory_space<vmem>>, vector<1x32xf32>
    %c0_24 = arith.constant 0 : index
    %c0_25 = arith.constant 0 : index
    %c0_26 = arith.constant 0 : index
    %16 = vector.load %arg6[%c0_24, %c0_25, %c0_26] : memref<2x32x32xf32, #tpu.memory_space<vmem>>, vector<1x32x32xf32>
    %17 = vector.shape_cast %16 : vector<1x32x32xf32> to vector<32x32xf32>
    %c0_27 = arith.constant 0 : index
    %c0_28 = arith.constant 0 : index
    %18 = vector.load %arg7[%c0_27, %c0_28] : memref<2x32xf32, #tpu.memory_space<vmem>>, vector<1x32xf32>
    %cst_29 = arith.constant dense<0.000000e+00> : vector<16x32xf32>
    %19 = tpu.matmul %5, %14, %cst_29 {dimension_numbers = #tpu.dot_dimension_numbers<[1], [0], [0], [1], [0, 0, 1, 1], [], []>} : vector<16x32xf32>, vector<32x32xf32>, vector<16x32xf32> -> vector<16x32xf32>
    %20 = vector.broadcast %15 : vector<1x32xf32> to vector<16x32xf32>
    %21 = arith.addf %19, %20 : vector<16x32xf32>
    %cst_30 = arith.constant 0.000000e+00 : f32
    %22 = vector.broadcast %cst_30 : f32 to vector<16x32xf32>
    %23 = arith.maximumf %21, %22 : vector<16x32xf32>
    %cst_31 = arith.constant dense<0.000000e+00> : vector<24x32xf32>
    %24 = tpu.matmul %7, %23, %cst_31 {dimension_numbers = #tpu.dot_dimension_numbers<[1], [0], [0], [1], [0, 0, 1, 1], [], []>} : vector<24x16xf32>, vector<16x32xf32>, vector<24x32xf32> -> vector<24x32xf32>
    %25 = vector.broadcast %9 : vector<24x1xf32> to vector<24x32xf32>
    %26 = arith.mulf %24, %25 : vector<24x32xf32>
    %cst_32 = arith.constant dense<0.000000e+00> : vector<8x32xf32>
    %27 = tpu.matmul %8, %26, %cst_32 {dimension_numbers = #tpu.dot_dimension_numbers<[0], [0], [1], [1], [0, 1, 1, 1], [], []>} : vector<24x8xf32>, vector<24x32xf32>, vector<8x32xf32> -> vector<8x32xf32>
    %28 = arith.addf %6, %27 : vector<8x32xf32>
    %29 = vector.broadcast %12 : vector<8x1xf32> to vector<8x32xf32>
    %30 = arith.mulf %28, %29 : vector<8x32xf32>
    %cst_33 = arith.constant dense<0.000000e+00> : vector<8x32xf32>
    %31 = tpu.matmul %30, %17, %cst_33 {dimension_numbers = #tpu.dot_dimension_numbers<[1], [0], [0], [1], [0, 0, 1, 1], [], []>} : vector<8x32xf32>, vector<32x32xf32>, vector<8x32xf32> -> vector<8x32xf32>
    %32 = vector.broadcast %18 : vector<1x32xf32> to vector<8x32xf32>
    %33 = arith.addf %31, %32 : vector<8x32xf32>
    %cst_34 = arith.constant 0.000000e+00 : f32
    %34 = vector.broadcast %cst_34 : f32 to vector<8x32xf32>
    %35 = arith.maximumf %33, %34 : vector<8x32xf32>
    %cst_35 = arith.constant dense<0.000000e+00> : vector<24x32xf32>
    %36 = tpu.matmul %8, %35, %cst_35 {dimension_numbers = #tpu.dot_dimension_numbers<[1], [0], [0], [1], [0, 0, 1, 1], [], []>} : vector<24x8xf32>, vector<8x32xf32>, vector<24x32xf32> -> vector<24x32xf32>
    %37 = vector.broadcast %10 : vector<24x1xf32> to vector<24x32xf32>
    %38 = arith.mulf %36, %37 : vector<24x32xf32>
    %cst_36 = arith.constant 5.000000e-01 : f32
    %39 = vector.broadcast %cst_36 : f32 to vector<16x32xf32>
    %40 = arith.mulf %5, %39 : vector<16x32xf32>
    %cst_37 = arith.constant dense<0.000000e+00> : vector<16x32xf32>
    %41 = tpu.matmul %7, %38, %cst_37 {dimension_numbers = #tpu.dot_dimension_numbers<[0], [0], [1], [1], [0, 1, 1, 1], [], []>} : vector<24x16xf32>, vector<24x32xf32>, vector<16x32xf32> -> vector<16x32xf32>
    %42 = arith.addf %40, %41 : vector<16x32xf32>
    %43 = vector.broadcast %11 : vector<16x1xf32> to vector<16x32xf32>
    %44 = arith.mulf %42, %43 : vector<16x32xf32>
    %c1 = arith.constant 1 : index
    %c0_38 = arith.constant 0 : index
    %c0_39 = arith.constant 0 : index
    %45 = vector.load %arg4[%c1, %c0_38, %c0_39] : memref<2x32x32xf32, #tpu.memory_space<vmem>>, vector<1x32x32xf32>
    %46 = vector.shape_cast %45 : vector<1x32x32xf32> to vector<32x32xf32>
    %c1_40 = arith.constant 1 : index
    %c0_41 = arith.constant 0 : index
    %47 = vector.load %arg5[%c1_40, %c0_41] : memref<2x32xf32, #tpu.memory_space<vmem>>, vector<1x32xf32>
    %c1_42 = arith.constant 1 : index
    %c0_43 = arith.constant 0 : index
    %c0_44 = arith.constant 0 : index
    %48 = vector.load %arg6[%c1_42, %c0_43, %c0_44] : memref<2x32x32xf32, #tpu.memory_space<vmem>>, vector<1x32x32xf32>
    %49 = vector.shape_cast %48 : vector<1x32x32xf32> to vector<32x32xf32>
    %c1_45 = arith.constant 1 : index
    %c0_46 = arith.constant 0 : index
    %50 = vector.load %arg7[%c1_45, %c0_46] : memref<2x32xf32, #tpu.memory_space<vmem>>, vector<1x32xf32>
    %cst_47 = arith.constant dense<0.000000e+00> : vector<16x32xf32>
    %51 = tpu.matmul %44, %46, %cst_47 {dimension_numbers = #tpu.dot_dimension_numbers<[1], [0], [0], [1], [0, 0, 1, 1], [], []>} : vector<16x32xf32>, vector<32x32xf32>, vector<16x32xf32> -> vector<16x32xf32>
    %52 = vector.broadcast %47 : vector<1x32xf32> to vector<16x32xf32>
    %53 = arith.addf %51, %52 : vector<16x32xf32>
    %cst_48 = arith.constant 0.000000e+00 : f32
    %54 = vector.broadcast %cst_48 : f32 to vector<16x32xf32>
    %55 = arith.maximumf %53, %54 : vector<16x32xf32>
    %cst_49 = arith.constant dense<0.000000e+00> : vector<24x32xf32>
    %56 = tpu.matmul %7, %55, %cst_49 {dimension_numbers = #tpu.dot_dimension_numbers<[1], [0], [0], [1], [0, 0, 1, 1], [], []>} : vector<24x16xf32>, vector<16x32xf32>, vector<24x32xf32> -> vector<24x32xf32>
    %57 = vector.broadcast %9 : vector<24x1xf32> to vector<24x32xf32>
    %58 = arith.mulf %56, %57 : vector<24x32xf32>
    %cst_50 = arith.constant dense<0.000000e+00> : vector<8x32xf32>
    %59 = tpu.matmul %8, %58, %cst_50 {dimension_numbers = #tpu.dot_dimension_numbers<[0], [0], [1], [1], [0, 1, 1, 1], [], []>} : vector<24x8xf32>, vector<24x32xf32>, vector<8x32xf32> -> vector<8x32xf32>
    %60 = arith.addf %30, %59 : vector<8x32xf32>
    %61 = vector.broadcast %12 : vector<8x1xf32> to vector<8x32xf32>
    %62 = arith.mulf %60, %61 : vector<8x32xf32>
    %cst_51 = arith.constant dense<0.000000e+00> : vector<8x32xf32>
    %63 = tpu.matmul %62, %49, %cst_51 {dimension_numbers = #tpu.dot_dimension_numbers<[1], [0], [0], [1], [0, 0, 1, 1], [], []>} : vector<8x32xf32>, vector<32x32xf32>, vector<8x32xf32> -> vector<8x32xf32>
    %64 = vector.broadcast %50 : vector<1x32xf32> to vector<8x32xf32>
    %65 = arith.addf %63, %64 : vector<8x32xf32>
    %cst_52 = arith.constant 0.000000e+00 : f32
    %66 = vector.broadcast %cst_52 : f32 to vector<8x32xf32>
    %67 = arith.maximumf %65, %66 : vector<8x32xf32>
    %cst_53 = arith.constant dense<0.000000e+00> : vector<24x32xf32>
    %68 = tpu.matmul %8, %67, %cst_53 {dimension_numbers = #tpu.dot_dimension_numbers<[1], [0], [0], [1], [0, 0, 1, 1], [], []>} : vector<24x8xf32>, vector<8x32xf32>, vector<24x32xf32> -> vector<24x32xf32>
    %69 = vector.broadcast %10 : vector<24x1xf32> to vector<24x32xf32>
    %70 = arith.mulf %68, %69 : vector<24x32xf32>
    %cst_54 = arith.constant 5.000000e-01 : f32
    %71 = vector.broadcast %cst_54 : f32 to vector<16x32xf32>
    %72 = arith.mulf %44, %71 : vector<16x32xf32>
    %cst_55 = arith.constant dense<0.000000e+00> : vector<16x32xf32>
    %73 = tpu.matmul %7, %70, %cst_55 {dimension_numbers = #tpu.dot_dimension_numbers<[0], [0], [1], [1], [0, 1, 1, 1], [], []>} : vector<24x16xf32>, vector<24x32xf32>, vector<16x32xf32> -> vector<16x32xf32>
    %74 = arith.addf %72, %73 : vector<16x32xf32>
    %75 = vector.broadcast %11 : vector<16x1xf32> to vector<16x32xf32>
    %76 = arith.mulf %74, %75 : vector<16x32xf32>
    %cst_56 = arith.constant dense<0.000000e+00> : vector<24x32xf32>
    %77 = tpu.matmul %7, %76, %cst_56 {dimension_numbers = #tpu.dot_dimension_numbers<[1], [0], [0], [1], [0, 0, 1, 1], [], []>} : vector<24x16xf32>, vector<16x32xf32>, vector<24x32xf32> -> vector<24x32xf32>
    %cst_57 = arith.constant dense<0.000000e+00> : vector<24x32xf32>
    %78 = tpu.matmul %8, %62, %cst_57 {dimension_numbers = #tpu.dot_dimension_numbers<[1], [0], [0], [1], [0, 0, 1, 1], [], []>} : vector<24x8xf32>, vector<8x32xf32>, vector<24x32xf32> -> vector<24x32xf32>
    %c0_58 = arith.constant 0 : index
    %c0_59 = arith.constant 0 : index
    %79 = vector.load %arg14[%c0_58, %c0_59] : memref<32x128xf32, #tpu.memory_space<vmem>>, vector<32x128xf32>
    %cst_60 = arith.constant dense<0.000000e+00> : vector<24x128xf32>
    %80 = tpu.matmul %77, %79, %cst_60 {dimension_numbers = #tpu.dot_dimension_numbers<[1], [0], [0], [1], [0, 0, 1, 1], [], []>} : vector<24x32xf32>, vector<32x128xf32>, vector<24x128xf32> -> vector<24x128xf32>
    %c0_61 = arith.constant 0 : index
    %c0_62 = arith.constant 0 : index
    %81 = vector.load %arg15[%c0_61, %c0_62] : memref<1x128xf32, #tpu.memory_space<vmem>>, vector<1x128xf32>
    %82 = vector.broadcast %81 : vector<1x128xf32> to vector<24x128xf32>
    %83 = arith.addf %80, %82 : vector<24x128xf32>
    %c0_63 = arith.constant 0 : index
    %c0_64 = arith.constant 0 : index
    %84 = vector.load %arg16[%c0_63, %c0_64] : memref<24x32xf32, #tpu.memory_space<vmem>>, vector<24x32xf32>
    tpu.vector_store %arg16[%c0_63, %c0_64], %77 {strides = array<i32>} : memref<24x32xf32, #tpu.memory_space<vmem>>, vector<24x32xf32>,
    %c0_65 = arith.constant 0 : index
    %c0_66 = arith.constant 0 : index
    %85 = vector.load %arg17[%c0_65, %c0_66] : memref<24x32xf32, #tpu.memory_space<vmem>>, vector<24x32xf32>
    tpu.vector_store %arg17[%c0_65, %c0_66], %78 {strides = array<i32>} : memref<24x32xf32, #tpu.memory_space<vmem>>, vector<24x32xf32>,
    %c0_67 = arith.constant 0 : index
    %c0_68 = arith.constant 0 : index
    %86 = vector.load %arg18[%c0_67, %c0_68] : memref<24x128xf32, #tpu.memory_space<vmem>>, vector<24x128xf32>
    tpu.vector_store %arg18[%c0_67, %c0_68], %83 {strides = array<i32>} : memref<24x128xf32, #tpu.memory_space<vmem>>, vector<24x128xf32>,
    return
  }
}

</mosaic_0001>

<bundles_post_ra>
// kernel: forward.1
= control target key start
LH: loop header
LB: loop body
LE: loop exit
PB: predicated region body
PF: predicated region fallthrough
CT: control target
= control target key end

     0   :  { %s2515_s0 = inlined_call_operand.vmem [shape: f32[16,16], index: 0, kind: input, shape index: {}]   ;;  %s2516_s1 = inlined_call_operand.vmem [shape: f32[8,32], index: 1, kind: input, shape index: {}]   ;;  %s2517_s2 = inlined_call_operand.vmem [shape: f32[16,32], index: 2, kind: input, shape index: {}]   ;;  %s2518_s3 = inlined_call_operand.vmem [shape: f32[1,32], index: 3, kind: input, shape index: {}]   ;;  %s2519_s4 = inlined_call_operand.vmem [shape: f32[2,32,32], index: 4, kind: input, shape index: {}]   ;;  %s2520_s5 = inlined_call_operand.vmem [shape: f32[2,32], index: 5, kind: input, shape index: {}]   ;;  %s2521_s6 = inlined_call_operand.vmem [shape: f32[2,32,32], index: 6, kind: input, shape index: {}]   ;;  %s2522_s7 = inlined_call_operand.vmem [shape: f32[2,32], index: 7, kind: input, shape index: {}]   ;;  %s2523_s8 = inlined_call_operand.vmem [shape: f32[24,16], index: 8, kind: input, shape index: {}]   ;;  %s2524_s9 = inlined_call_operand.vmem [shape: f32[24,8], index: 9, kind: input, shape index: {}]   ;;  %s2525_s10 = inlined_call_operand.vmem [shape: f32[24,1], index: 10, kind: input, shape index: {}]   ;;  %s2526_s11 = inlined_call_operand.vmem [shape: f32[24,1], index: 11, kind: input, shape index: {}]   ;;  %s2527_s12 = inlined_call_operand.vmem [shape: f32[16,1], index: 12, kind: input, shape index: {}]   ;;  %s2528_s13 = inlined_call_operand.vmem [shape: f32[8,1], index: 13, kind: input, shape index: {}]   ;;  %s2529_s14 = inlined_call_operand.vmem [shape: f32[32,128], index: 14, kind: input, shape index: {}]   ;;  %s2530_s15 = inlined_call_operand.vmem [shape: f32[1,128], index: 15, kind: input, shape index: {}]   ;;  %s2531_s16 = inlined_call_operand.hbm [shape: f32[24,32], index: 16, kind: output, shape index: {0}]   ;;  %s2532_s17 = inlined_call_operand.hbm [shape: f32[24,32], index: 17, kind: output, shape index: {1}]   ;;  %s2533_s18 = inlined_call_operand.vmem [shape: f32[24,128], index: 18, kind: output, shape index: {2}]  }
   0x1   :  { %2536 = sst [smem:[#allocation8_spill]] %s2515_s0 }
   0x2   :  { %2537 = sst [smem:[#allocation9_spill]] %s2516_s1 }
   0x3   :  { %2538 = sst [smem:[#allocation10_spill]] %s2517_s2 }
   0x4   :  { %24 = vsyncpa [#allocation3], 0  ;;  %s2539_s29 = sld [smem:[#allocation10_spill]]  ;;  %s2540_s20 = sld [smem:[#allocation8_spill]]  ;;  %vm69_vm0 = vcmask 130048   ;;  %v167_v4 = vld [vmem:[%s2519_s4] sm:$0xff] }
   0x5   :  { %v168_v5 = vld [vmem:[%s2519_s4 + $0x8] sm:$0xff] }
   0x6   :  { %v1908_v6 = vpack.c.bf16 %v168_v5, %v167_v4 }
   0xa   :  { %v60_v0 = vld [vmem:[%s2539_s29] sm:$0xff]  ;;  %v61_v1 = vld [vmem:[%s2539_s29 + $0x8] sm:$0xff] }
   0xb   :  { %v58_v2 = vld [vmem:[%s2540_s20] sm:$0xff]  ;;  %v1904_v3 = vpack.c.bf16 %v61_v1, %v60_v0 }
   0xc   :  { %1732 = vmatprep.mubr.msk.f32.mxu0 %vm69_vm0, %v58_v2 }
   0xd   :  { %25 = vsyncpa [#allocation5], 0  ;;  %1905 = vmatprep.subr.bf16.mxu0 %v1904_v3  ;;  %v59_v7 = vld [vmem:[%s2540_s20 + $0x8] sm:$0xff]  ;;  %1909 = vmatprep.subr.bf16.mxu1 %v1908_v6  ;;  %v169_v8 = vld [vmem:[%s2519_s4 + $0x10] sm:$0xff]  ;;  %v2023_v13 = vmov 0   ;;  %vm181_vm1 = vcmask 261120  }
   0xe   :  { %1907 = vmatpush3.bf16.msra.mxu0 %v1904_v3  ;;  %1911 = vmatpush3.bf16.msra.mxu1 %v1908_v6  ;;  %v170_v9 = vld [vmem:[%s2519_s4 + $0x18] sm:$0xff]  ;;  %v160_v11 = vld [vmem:[%s2525_s10 + $0x10] sm:$0xff]  ;;  %v158_v12 = vld [vmem:[%s2525_s10] sm:$0xff]  ;;  %v2024_v22 = vmov 0.0|0.0   ;;  %vm2025_vm2 = vmmov 0   ;;  %v2026_v23 = vmov 0.0  }
   0xf   :  { %v1912_v10 = vpack.c.bf16 %v170_v9, %v169_v8  ;;  %1974 = vset.pattern.permute.xlu1 %v2023_v13  ;;  %1973 = vset.pattern.permute.xlu0 %v2023_v13  ;;  %v159_v14 = vld [vmem:[%s2525_s10 + $0x8] sm:$0xff]  ;;  %v1601_v15 = vld [vmem:[%s2518_s3] ss:$0 sm:$0xff]  ;;  %v163_v25 = vld [vmem:[%s2526_s11 + $0x10] sm:$0xff]  ;;  %vm404_vm3 = vcmask 195584   ;;  %vm563_vm4 = vcmask 64512  }
  0x10   :  { %366 = vperm.xlu1 %1974, %v160_v11   ;;  %356 = vperm.xlu0 %1973, %v158_v12   ;;  %v166_v20 = vld [vmem:[%s2528_s13] sm:$0xff]  ;;  %v162_v24 = vld [vmem:[%s2526_s11 + $0x8] sm:$0xff]  ;;  %v2205_v28 = vld [vmem:[%s2524_s9 + $0x10] sm:$0xff] }
  0x11   :  { %1733 = vmatmul.mubr.msk.f32.vlgmr.msra.gmra.mrb[0].mxu0 %vm69_vm0, %v59_v7  ;;  %1913 = vmatprep.subr.bf16.mxu1 %v1912_v10  ;;  %v161_v21 = vld [vmem:[%s2526_s11] sm:$0xff]  ;;  %v2199_v27 = vld [vmem:[%s2524_s9 + $0x8] sm:$0xff]  ;;  %v2223_v31 = vld [vmem:[%s2523_s8 + $0x10] sm:$0xff]  ;;  %s2541_s11 = sld [smem:[#allocation9_spill]] }
  0x12   :  { %1915 = vmatpush3.bf16.msra.mxu1 %v1912_v10  ;;  %1916 = vmatprep.subr.bf16.mxu0 %v2024_v22  ;;  %v2193_v26 = vld [vmem:[%s2524_s9] sm:$0xff]  ;;  %v2217_v30 = vld [vmem:[%s2523_s8 + $0x8] sm:$0xff]  ;;  %v174_v59 = vld [vmem:[%s2521_s6 + $0x10] sm:$0xff]  ;;  %s2028_s9 = smov [#allocation4]  }
  0x13   :  { %1919 = vmatprep.subr.bf16.mxu1 %v2024_v22  ;;  %1750 = vmatprep.mubr.msk.f32.mxu0 %vm2025_vm2, %v2026_v23  ;;  %v2211_v29 = vld [vmem:[%s2523_s8] sm:$0xff]  ;;  %v165_v33 = vld [vmem:[%s2527_s12 + $0x8] sm:$0xff]  ;;  %v175_v60 = vld [vmem:[%s2521_s6 + $0x18] sm:$0xff]  ;;  %s1582_s10 = sshll.u32 %s2028_s9, 4  ;;  %s2472_s10 = int_to_ptr.vmem [resolvable:$true] %s1582_s10 }
  0x14   :  { %361 = vperm.xlu0 %1973, %v159_v14   ;;  %v164_v32 = vld [vmem:[%s2527_s12] sm:$0xff]  ;;  %v173_v43 = vld [vmem:[%s2521_s6 + $0x8] sm:$0xff]  ;;  %v1926_v61 = vpack.c.bf16 %v175_v60, %v174_v59 }
  0x15   :  { %v1604_v34 = vld [vmem:[%s2520_s5] ss:$0 sm:$0xff]  ;;  %v1619_v14 = vld [vmem:[%s2519_s4 + $0x28] sm:$0xff] }
  0x16   :  { %v172_v42 = vld [vmem:[%s2521_s6] sm:$0xff] }
  0x17   :  { %v1923_v44 = vpack.c.bf16 %v173_v43, %v172_v42  ;;  %v151_v1 = vld [vmem:[%s2541_s11] sm:$0xff] }
  0x18   :  { %481 = vperm.xlu0 %1973, %v166_v20   ;;  %v1611_v8 = vld [vmem:[%s2522_s7] ss:$0 sm:$0xff] }
  0x19   :  { %v1618_v13 = vld [vmem:[%s2519_s4 + $0x20] sm:$0xff] }
  0x1a   :  { %v1622_v60 = vld [vmem:[%s2521_s6 + $0x20] sm:$0xff] }
  0x1c   :  { %655 = vperm.xlu0 %1973, %v161_v21  }
  0x20   :  { %660 = vperm.xlu0 %1973, %v162_v24  }
  0x24   :  { %665 = vperm.xlu0 %1973, %v163_v25  }
  0x39   :  { %372 = vxpose.xlu1.b32.start [1/3] (short) (narrow) %v2193_v26, 8 }
  0x3d   :  { %373 = vxpose.xlu1.b32.cont [2/3] (short) (narrow) %v2199_v27, 8 }
  0x41   :  { %374 = vxpose.xlu1.b32.end [3/3] (short) (narrow) %v2205_v28, 8 }
  0x42   :  { %673 = vxpose.xlu0.b32.start [1/3] (short) (narrow) %v2211_v29, 16 }
  0x46   :  { %674 = vxpose.xlu0.b32.cont [2/3] (short) (narrow) %v2217_v30, 16 }
  0x4a   :  { %675 = vxpose.xlu0.b32.end [3/3] (short) (narrow) %v2223_v31, 16 }
  0x5f   :  { %790 = vperm.xlu1 %1974, %v164_v32  }
  0x73   :  { %795 = vperm.xlu0 %1973, %v165_v33  }
  0x8f   :  { %v2255_v45 = vpop.permute.xlu0 %356  ;;  %v2261_v53 = vpop.permute.xlu1 %366 }
  0x93   :  { %v2257_v48 = vpop.permute.xlu0 %361 }
  0x97   :  { %v2278_v62 = vpop.permute.xlu0 %481 }
  0x9b   :  { %v2280_v63 = vpop.permute.xlu0 %655 }
  0x9f   :  { %v2282_v0 = vpop.permute.xlu0 %660 }
  0xa3   :  { %v2287_v2 = vpop.permute.xlu0 %665 }
  0xb9   :  { %v2265_v58 = vpop.trf.xlu1 }
  0xc2   :  { %v2292_v7 = vpop.trf.xlu0 }
  0xe4   :  { %v1734_v16 = vpop.f32.mrb[0].mxu0 }
  0xe5   :  { %v142_v17 = vpop.f32.mrb[1].mxu0  ;;  %v2166_v19 = vadd.f32 %v1734_v16, %v1601_v15 }
  0xe6   :  { %v2164_v18 = vadd.f32 %v1601_v15, %v142_v17  ;;  %v1932_v15 = vpack.c.bf16 %v1619_v14, %v1618_v13 }
  0xe8   :  { %1743 = vmatprep.mubr.msk.f32.mxu1 %vm181_vm1, %v2164_v18  ;;  %v671_v42 = vmul.f32 0.5, %v2164_v18  ;;  %v1626_v18 = vld [vmem:[%s2520_s5 + $0x1] ss:$0 sm:$0xff] }
  0xe9   :  { %1744 = vmatmul.mubr.msk.f32.vlgmr.msra.gmra.mrb[0].mxu1 %vm181_vm1, %v2166_v19 }
  0xea   :  { %1765 = vmatprep.mubr.msk.f32.mxu1 %vm2025_vm2, %v2026_v23 }
 0x1bc   :  { %v1745_v35 = vpop.f32.mrb[0].mxu1 }
 0x1bd   :  { %v260_v36 = vadd.f32 %v1745_v35, %v1604_v34  ;;  %v254_v37 = vpop.f32.mrb[1].mxu1 }
 0x1be   :  { %v255_v38 = vadd.f32 %v1604_v34, %v254_v37  ;;  %v1620_v37 = vld [vmem:[%s2519_s4 + $0x30] sm:$0xff] }
 0x1bf   :  { %v264_v39 = vmax.f32 %v260_v36, 0.0  ;;  %v2320_v36 = vpop.trf.xlu0 }
 0x1c0   :  { %v263_v40 = vmax.f32 %v255_v38, 0.0  ;;  %v1621_v38 = vld [vmem:[%s2519_s4 + $0x38] sm:$0xff] }
 0x1c2   :  { %v1917_v41 = vpack.c.bf16 %v264_v39, %v263_v40  ;;  %v1936_v39 = vpack.c.bf16 %v1621_v38, %v1620_v37  ;;  %v672_v40 = vmul.f32 0.5, %v2166_v19 }
 0x1c4   :  { %1918 = vmatpush3.bf16.msra.mxu0 %v1917_v41 }
 0x1c5   :  { %1922 = vmatprep.subr.bf16.mxu0 %v2024_v22 }
 0x1c7   :  { %1751 = vmatmul.mubr.msk.f32.vlgmr.msra.gmra.mrb[2].mxu0 %vm69_vm0, %v2211_v29 }
 0x1c8   :  { %1753 = vmatprep.mubr.msk.f32.mxu0 %vm2025_vm2, %v2026_v23  ;;  %1924 = vmatpush3.bf16.msra.mxu0 %v1923_v44 }
 0x1c9   :  { %1925 = vmatprep.subr.bf16.mxu0 %v2024_v22 }
 0x1cb   :  { %1754 = vmatmul.mubr.msk.f32.gmra.mrb[4].mxu0 %vm69_vm0, %v2217_v30 }
 0x1cc   :  { %1756 = vmatprep.mubr.msk.f32.mxu0 %vm2025_vm2, %v2026_v23  ;;  %1927 = vmatpush3.bf16.msra.mxu0 %v1926_v61  ;;  %v1623_v61 = vld [vmem:[%s2521_s6 + $0x28] sm:$0xff] }
 0x1cf   :  { %1757 = vmatmul.mubr.msk.f32.gmra.mrb[6].mxu0 %vm69_vm0, %v2223_v31 }
 0x1d0   :  { %1776 = vmatprep.mubr.msk.f32.mxu0 %vm2025_vm2, %v2026_v23 }
 0x29a   :  { %v340_v46 = vpop.f32.mrb[2].mxu0 }
 0x29b   :  { %v1752_v47 = vpop.f32.mrb[3].mxu0  ;;  %v369_v50 = vmul.f32 %v2255_v45, %v340_v46 }
 0x29c   :  { %v2336_v47 = vpop.permute.xlu1 %790 }
 0x29e   :  { %v345_v49 = vpop.f32.mrb[4].mxu0 }
 0x29f   :  { %v370_v51 = vmul.f32 %v2257_v48, %v345_v49  ;;  %v1755_v52 = vpop.f32.mrb[5].mxu0  ;;  %v2338_v49 = vpop.permute.xlu0 %795 }
 0x2a1   :  { %v1920_v54 = vpack.c.bf16 %v370_v51, %v369_v50 }
 0x2a2   :  { %v350_v55 = vpop.f32.mrb[6].mxu0 }
 0x2a3   :  { %1921 = vmatpush3.bf16.msra.mxu1 %v1920_v54  ;;  %v1758_v56 = vpop.f32.mrb[7].mxu0  ;;  %v371_v57 = vmul.f32 %v2261_v53, %v350_v55 }
 0x2a4   :  { %1763 = vmatprep.subr.mxu1 %v2026_v23 }
 0x2a7   :  { %1764 = vmatpush3.msra.mxu1 %v371_v57 }
 0x2a8   :  { %1766 = vmatmul.mubr.msk.f32.vlgmr.msra.gmra.mrb[2].mxu1 %vm404_vm3, %v2265_v58  ;;  %1779 = vmatprep.subr.mxu1 %v2026_v23 }
 0x2a9   :  { %1781 = vmatprep.mubr.msk.f32.mxu1 %vm2025_vm2, %v2026_v23 }
 0x37b   :  { %v474_v3 = vpop.f32.mrb[2].mxu1 }
 0x37c   :  { %v478_v4 = vadd.f32 %v474_v3, %v151_v1  ;;  %v1767_v5 = vpop.f32.mrb[3].mxu1  ;;  %v1947_v1 = vpack.c.bf16 %v1623_v61, %v1622_v60 }
 0x37e   :  { %v2290_v6 = vmul.f32 %v2278_v62, %v478_v4 }
 0x380   :  { %1777 = vmatmul.mubr.msk.f32.vlgmr.msra.gmra.mrb[8].mxu0 %vm181_vm1, %v2290_v6 }
 0x381   :  { %1796 = vmatprep.mubr.msk.f32.mxu0 %vm404_vm3, %v2292_v7 }
 0x453   :  { %v558_v9 = vpop.f32.mrb[8].mxu0 }
 0x454   :  { %v559_v10 = vadd.f32 %v1611_v8, %v558_v9  ;;  %v1778_v11 = vpop.f32.mrb[9].mxu0 }
 0x456   :  { %v562_v12 = vmax.f32 %v559_v10, 0.0 }
 0x458   :  { %1780 = vmatpush3.msra.mxu1 %v562_v12 }
 0x459   :  { %1782 = vmatmul.mubr.msk.f32.vlgmr.msra.gmra.mrb[4].mxu1 %vm563_vm4, %v2193_v26  ;;  %1933 = vmatprep.subr.bf16.mxu1 %v1932_v15 }
 0x45a   :  { %1784 = vmatprep.mubr.msk.f32.mxu1 %vm2025_vm2, %v2026_v23  ;;  %1935 = vmatpush3.bf16.msra.mxu1 %v1932_v15 }
 0x45b   :  { %1937 = vmatprep.subr.bf16.mxu1 %v1936_v39 }
 0x45d   :  { %1785 = vmatmul.mubr.msk.f32.gmra.mrb[6].mxu1 %vm563_vm4, %v2199_v27 }
 0x45e   :  { %1787 = vmatprep.mubr.msk.f32.mxu1 %vm2025_vm2, %v2026_v23  ;;  %1939 = vmatpush3.bf16.msra.mxu1 %v1936_v39 }
 0x45f   :  { %1943 = vmatprep.subr.bf16.mxu1 %v2024_v22 }
 0x461   :  { %1788 = vmatmul.mubr.msk.f32.gmra.mrb[8].mxu1 %vm563_vm4, %v2205_v28 }
 0x52c   :  { %v639_v16 = vpop.f32.mrb[4].mxu1 }
 0x52d   :  { %v1783_v17 = vpop.f32.mrb[5].mxu1  ;;  %v668_v21 = vmul.f32 %v2280_v63, %v639_v16 }
 0x530   :  { %v644_v20 = vpop.f32.mrb[6].mxu1 }
 0x531   :  { %v669_v24 = vmul.f32 %v2282_v0, %v644_v20  ;;  %v1786_v25 = vpop.f32.mrb[7].mxu1  ;;  %v1633_v20 = vld [vmem:[%s2522_s7 + $0x1] ss:$0 sm:$0xff] }
 0x533   :  { %v1928_v32 = vpack.c.bf16 %v669_v24, %v668_v21 }
 0x534   :  { %v649_v33 = vpop.f32.mrb[8].mxu1 }
 0x535   :  { %v670_v34 = vmul.f32 %v2287_v2, %v649_v33  ;;  %1929 = vmatprep.subr.bf16.mxu0 %v1928_v32  ;;  %v1789_v35 = vpop.f32.mrb[9].mxu1 }
 0x536   :  { %1931 = vmatpush3.bf16.msra.mxu0 %v1928_v32 }
 0x537   :  { %1794 = vmatprep.subr.mxu0 %v670_v34 }
 0x53a   :  { %1795 = vmatpush3.msra.mxu0 %v670_v34 }
 0x53b   :  { %1797 = vmatmul.mubr.msk.f32.vlgmr.msra.gmra.mrb[10].mxu0 %vm404_vm3, %v2320_v36  ;;  %1940 = vmatprep.subr.bf16.mxu0 %v2024_v22 }
 0x53c   :  { %1814 = vmatprep.mubr.msk.f32.mxu0 %vm2025_vm2, %v2026_v23 }
 0x60e   :  { %v1798_v41 = vpop.f32.mrb[10].mxu0 }
 0x60f   :  { %v787_v43 = vadd.f32 %v1798_v41, %v672_v40  ;;  %v777_v44 = vpop.f32.mrb[11].mxu0 }
 0x610   :  { %v786_v46 = vadd.f32 %v777_v44, %v671_v42 }
 0x611   :  { %v2344_v51 = vmul.f32 %v2338_v49, %v787_v43 }
 0x612   :  { %v2341_v50 = vmul.f32 %v2336_v47, %v786_v46 }
 0x614   :  { %1807 = vmatprep.mubr.msk.f32.mxu1 %vm181_vm1, %v2341_v50 }
 0x615   :  { %1808 = vmatmul.mubr.msk.f32.vlgmr.msra.gmra.mrb[10].mxu1 %vm181_vm1, %v2344_v51 }
 0x616   :  { %1829 = vmatprep.mubr.msk.f32.mxu1 %vm2025_vm2, %v2026_v23 }
 0x6e8   :  { %v1809_v19 = vpop.f32.mrb[10].mxu1 }
 0x6e9   :  { %v894_v52 = vadd.f32 %v1809_v19, %v1626_v18  ;;  %v888_v54 = vpop.f32.mrb[11].mxu1 }
 0x6ea   :  { %v889_v55 = vadd.f32 %v1626_v18, %v888_v54 }
 0x6eb   :  { %v898_v56 = vmax.f32 %v894_v52, 0.0 }
 0x6ec   :  { %v897_v57 = vmax.f32 %v889_v55, 0.0 }
 0x6ee   :  { %v1941_v59 = vpack.c.bf16 %v898_v56, %v897_v57 }
 0x6f0   :  { %1942 = vmatpush3.bf16.msra.mxu0 %v1941_v59 }
 0x6f1   :  { %1946 = vmatprep.subr.bf16.mxu0 %v2024_v22 }
 0x6f3   :  { %1815 = vmatmul.mubr.msk.f32.vlgmr.msra.gmra.mrb[12].mxu0 %vm69_vm0, %v2211_v29 }
 0x6f4   :  { %1817 = vmatprep.mubr.msk.f32.mxu0 %vm2025_vm2, %v2026_v23  ;;  %1948 = vmatpush3.bf16.msra.mxu0 %v1947_v1 }
 0x6f5   :  { %1949 = vmatprep.subr.bf16.mxu0 %v2024_v22 }
 0x6f7   :  { %1818 = vmatmul.mubr.msk.f32.gmra.mrb[14].mxu0 %vm69_vm0, %v2217_v30 }
 0x6f8   :  { %1820 = vmatprep.mubr.msk.f32.mxu0 %vm2025_vm2, %v2026_v23 }
 0x6fb   :  { %1821 = vmatmul.mubr.msk.f32.gmra.mrb[16].mxu0 %vm69_vm0, %v2223_v31 }
 0x6fc   :  { %1840 = vmatprep.mubr.msk.f32.mxu0 %vm2025_vm2, %v2026_v23 }
 0x7c6   :  { %v965_v3 = vpop.f32.mrb[12].mxu0 }
 0x7c7   :  { %v1816_v4 = vpop.f32.mrb[13].mxu0  ;;  %v979_v8 = vmul.f32 %v965_v3, %v2255_v45  ;;  %v1624_v45 = vld [vmem:[%s2521_s6 + $0x30] sm:$0xff] }
 0x7ca   :  { %v970_v5 = vpop.f32.mrb[14].mxu0 }
 0x7cb   :  { %v980_v9 = vmul.f32 %v970_v5, %v2257_v48  ;;  %v1819_v10 = vpop.f32.mrb[15].mxu0  ;;  %v1625_v48 = vld [vmem:[%s2521_s6 + $0x38] sm:$0xff] }
 0x7cc   :  { %v1950_v15 = vpack.c.bf16 %v1625_v48, %v1624_v45 }
 0x7cd   :  { %v1944_v11 = vpack.c.bf16 %v980_v9, %v979_v8 }
 0x7ce   :  { %v975_v12 = vpop.f32.mrb[16].mxu0  ;;  %1951 = vmatpush3.bf16.msra.mxu0 %v1950_v15 }
 0x7cf   :  { %1945 = vmatpush3.bf16.msra.mxu1 %v1944_v11  ;;  %v1822_v13 = vpop.f32.mrb[17].mxu0  ;;  %v981_v14 = vmul.f32 %v975_v12, %v2261_v53  ;;  %1956 = vmatprep.subr.bf16.mxu0 %v2024_v22 }
 0x7d0   :  { %1827 = vmatprep.subr.mxu1 %v2026_v23 }
 0x7d3   :  { %1828 = vmatpush3.msra.mxu1 %v981_v14 }
 0x7d4   :  { %1830 = vmatmul.mubr.msk.f32.vlgmr.msra.gmra.mrb[12].mxu1 %vm404_vm3, %v2265_v58  ;;  %1843 = vmatprep.subr.mxu1 %v2026_v23 }
 0x7d5   :  { %1845 = vmatprep.mubr.msk.f32.mxu1 %vm2025_vm2, %v2026_v23 }
 0x8a7   :  { %v1048_v53 = vpop.f32.mrb[12].mxu1 }
 0x8a8   :  { %v1052_v58 = vadd.f32 %v1048_v53, %v2290_v6  ;;  %v1831_v16 = vpop.f32.mrb[13].mxu1 }
 0x8aa   :  { %v1053_v17 = vmul.f32 %v1052_v58, %v2278_v62 }
 0x8ac   :  { %1841 = vmatmul.mubr.msk.f32.vlgmr.msra.gmra.mrb[18].mxu0 %vm181_vm1, %v1053_v17 }
 0x8ad   :  { %1867 = vmatprep.mubr.msk.f32.mxu0 %vm2025_vm2, %v2026_v23 }
 0x97f   :  { %v1127_v21 = vpop.f32.mrb[18].mxu0 }
 0x980   :  { %v1128_v24 = vadd.f32 %v1633_v20, %v1127_v21  ;;  %v1842_v25 = vpop.f32.mrb[19].mxu0 }
 0x982   :  { %v1131_v32 = vmax.f32 %v1128_v24, 0.0 }
 0x984   :  { %1844 = vmatpush3.msra.mxu1 %v1131_v32 }
 0x985   :  { %1846 = vmatmul.mubr.msk.f32.vlgmr.msra.gmra.mrb[14].mxu1 %vm563_vm4, %v2193_v26 }
 0x986   :  { %1848 = vmatprep.mubr.msk.f32.mxu1 %vm2025_vm2, %v2026_v23 }
 0x989   :  { %1849 = vmatmul.mubr.msk.f32.gmra.mrb[16].mxu1 %vm563_vm4, %v2199_v27 }
 0x98a   :  { %1851 = vmatprep.mubr.msk.f32.mxu1 %vm2025_vm2, %v2026_v23 }
 0x98d   :  { %1852 = vmatmul.mubr.msk.f32.gmra.mrb[18].mxu1 %vm563_vm4, %v2205_v28 }
 0x98e   :  { %1860 = vmatprep.mubr.msk.f32.mxu1 %vm404_vm3, %v2292_v7 }
 0xa58   :  { %v1198_v62 = vpop.f32.mrb[14].mxu1 }
 0xa59   :  { %v1847_v6 = vpop.f32.mrb[15].mxu1  ;;  %v1212_v34 = vmul.f32 %v1198_v62, %v2280_v63  ;;  %v1216_v63 = vmul.f32 0.5, %v2344_v51 }
 0xa5c   :  { %v1203_v33 = vpop.f32.mrb[16].mxu1 }
 0xa5d   :  { %v1213_v35 = vmul.f32 %v1203_v33, %v2282_v0  ;;  %v1850_v37 = vpop.f32.mrb[17].mxu1 }
 0xa5f   :  { %v1952_v38 = vpack.c.bf16 %v1213_v35, %v1212_v34 }
 0xa60   :  { %v1208_v39 = vpop.f32.mrb[18].mxu1 }
 0xa61   :  { %v1214_v40 = vmul.f32 %v1208_v39, %v2287_v2  ;;  %1953 = vmatprep.subr.bf16.mxu1 %v1952_v38  ;;  %v1853_v41 = vpop.f32.mrb[19].mxu1  ;;  %v1215_v2 = vmul.f32 0.5, %v2341_v50  ;;  %v1458_v50 = vld [vmem:[%s2529_s14 + $0x10] sm:$0xff] }
 0xa62   :  { %1955 = vmatpush3.bf16.msra.mxu1 %v1952_v38 }
 0xa63   :  { %1858 = vmatprep.subr.mxu1 %v1214_v40 }
 0xa66   :  { %1859 = vmatpush3.msra.mxu1 %v1214_v40 }
 0xa67   :  { %1861 = vmatmul.mubr.msk.f32.vlgmr.msra.gmra.mrb[20].mxu1 %vm404_vm3, %v2320_v36  ;;  %1876 = vmatprep.subr.mxu1 %v2026_v23 }
 0xa68   :  { %1877 = vmatpush3.msra.mxu1 %v1053_v17  ;;  %1878 = vmatprep.mubr.msk.f32.mxu1 %vm2025_vm2, %v2026_v23 }
 0xa6b   :  { %1879 = vmatmul.mubr.msk.f32.vlgmr.msra.gmra.mrb[22].mxu1 %vm563_vm4, %v2193_v26 }
 0xa6c   :  { %1881 = vmatprep.mubr.msk.f32.mxu1 %vm2025_vm2, %v2026_v23 }
 0xa6f   :  { %1882 = vmatmul.mubr.msk.f32.gmra.mrb[24].mxu1 %vm563_vm4, %v2199_v27  ;;  %v1456_v27 = vld [vmem:[%s2529_s14] sm:$0xff] }
 0xa70   :  { %1884 = vmatprep.mubr.msk.f32.mxu1 %vm2025_vm2, %v2026_v23 }
 0xa73   :  { %1885 = vmatmul.mubr.msk.f32.gmra.mrb[26].mxu1 %vm563_vm4, %v2205_v28  ;;  %v1457_v28 = vld [vmem:[%s2529_s14 + $0x8] sm:$0xff] }
 0xa74   :  { %v1960_v46 = vpack.c.bf16 %v1457_v28, %v1456_v27 }
 0xb3a   :  { %v1862_v0 = vpop.f32.mrb[20].mxu1 }
 0xb3b   :  { %v1293_v7 = vadd.f32 %v1862_v0, %v1216_v63  ;;  %v1283_v36 = vpop.f32.mrb[21].mxu1 }
 0xb3c   :  { %v1292_v26 = vadd.f32 %v1283_v36, %v1215_v2 }
 0xb3d   :  { %v1295_v42 = vmul.f32 %v1293_v7, %v2338_v49 }
 0xb3e   :  { %v1294_v43 = vmul.f32 %v1292_v26, %v2336_v47  ;;  %v1459_v47 = vld [vmem:[%s2529_s14 + $0x18] sm:$0xff]  ;;  %v1442_v19 = vpop.f32.mrb[22].mxu1  ;;  %s2027_s14 = smov [#allocation2]  }
 0xb3f   :  { %v1963_v49 = vpack.c.bf16 %v1459_v47, %v1458_v50  ;;  %1559 = vst.msk [vmem:[#allocation4] sm:$0xff] %vm181_vm1, %v1442_v19  ;;  %v1880_v52 = vpop.f32.mrb[23].mxu1  ;;  %s1570_s23 = sshll.u32 %s2027_s14, 4  ;;  %s1571_s23 = int_to_ptr.vmem [resolvable:$true] %s1570_s23 }
 0xb40   :  { %v1957_v44 = vpack.c.bf16 %v1295_v42, %v1294_v43  ;;  %s1975_s24 = scalar_lea.vmem %s1571_s23, 384  ;;  %p1980_p1 = scmp.lt.s32.totalorder %s1571_s23, %s1571_s23 }
 0xb41   :  { %p1976_p0 = scmp.ne.s32.totalorder %s1571_s23, %s1975_s24  ;;  %p1981_p2 = scmp.lt.s32.totalorder %s1975_s24, %s1975_s24 }
 0xb42   :  { %1958 = vmatpush3.bf16.msra.mxu0 %v1957_v44  ;;  %v1447_v54 = vpop.f32.mrb[24].mxu1 }
 0xb43   :  { %1959 = vmatprep.subr.bf16.mxu0 %v2024_v22  ;;  %1560 = vst.msk [vmem:[#allocation4 + $0x8] sm:$0xff] %vm181_vm1, %v1447_v54  ;;  %v1883_v55 = vpop.f32.mrb[25].mxu1  ;;  %p1982_p3 = por %p1981_p2, %p1980_p1 }
 0xb45   :  { %1868 = vmatmul.mubr.msk.f32.vlgmr.msra.gmra.mrb[20].mxu0 %vm69_vm0, %v2211_v29  ;;  %p1983_p4 = pnand %p1982_p3, %p1976_p0 }
 0xb46   :  { %1870 = vmatprep.mubr.msk.f32.mxu0 %vm2025_vm2, %v2026_v23  ;;  %1961 = vmatpush3.bf16.msra.mxu0 %v1960_v46  ;;  %v1452_v56 = vpop.f32.mrb[26].mxu1 }
 0xb47   :  { %1962 = vmatprep.subr.bf16.mxu0 %v2024_v22  ;;  %1561 = vst.msk [vmem:[#allocation4 + $0x10] sm:$0xff] %vm181_vm1, %v1452_v56  ;;  %v1886_v57 = vpop.f32.mrb[27].mxu1 }
 0xb49   :  { %1871 = vmatmul.mubr.msk.f32.gmra.mrb[22].mxu0 %vm69_vm0, %v2217_v30 }
 0xb4a   :  { %1873 = vmatprep.mubr.msk.f32.mxu0 %vm2025_vm2, %v2026_v23  ;;  %1964 = vmatpush3.bf16.msra.mxu0 %v1963_v49 }
 0xb4d   :  { %1874 = vmatmul.mubr.msk.f32.gmra.mrb[24].mxu0 %vm69_vm0, %v2223_v31 }
 0xb4e   :  { %1895 = vmatprep.mubr.msk.f32.mxu0 %vm2025_vm2, %v2026_v23 }
 0xc18   :  { %v1362_v29 = vpop.f32.mrb[20].mxu0 }
 0xc19   :  { %1556 = vst.msk [vmem:[#allocation2] sm:$0xff] %vm181_vm1, %v1362_v29  ;;  %v1869_v51 = vpop.f32.mrb[21].mxu0  ;;  %1896 = vmatmul.mubr.msk.f32.vlgmr.msra.gmra.mrb[26].mxu0 %vm181_vm1, %v1362_v29 }
 0xc1a   :  { %1898 = vmatprep.mubr.msk.f32.mxu0 %vm2025_vm2, %v2026_v23 }
 0xc1c   :  { %v1367_v22 = vpop.f32.mrb[22].mxu0 }
 0xc1d   :  { %1557 = vst.msk [vmem:[#allocation2 + $0x8] sm:$0xff] %vm181_vm1, %v1367_v22  ;;  %v1872_v30 = vpop.f32.mrb[23].mxu0  ;;  %1899 = vmatmul.mubr.msk.f32.gmra.mrb[28].mxu0 %vm181_vm1, %v1367_v22 }
 0xc1e   :  { %1901 = vmatprep.mubr.msk.f32.mxu0 %vm2025_vm2, %v2026_v23 }
 0xc20   :  { %v1372_v31 = vpop.f32.mrb[24].mxu0 }
 0xc21   :  { %1558 = vst.msk [vmem:[#allocation2 + $0x10] sm:$0xff] %vm181_vm1, %v1372_v31  ;;  %v1875_v18 = vpop.f32.mrb[25].mxu0  ;;  %1902 = vmatmul.mubr.msk.f32.gmra.mrb[30].mxu0 %vm181_vm1, %v1372_v31 }
 0xc22   :  { %1986 = shalt.err (!%p1983_p4)
}
 0xc23   :  { %s1987_s4 = scalar_lea.hbm %s2531_s16, 384 }
 0xc24   :  { %p1988_p5 = scmp.ne.s32.totalorder %s2531_s16, %s1987_s4  ;;  %p1991_p6 = scmp.lt.u32.totalorder %s1987_s4, %s2531_s16 }
 0xc26   :  { %p1993_p7 = pnand %p1991_p6, %p1988_p5 }
 0xc28   :  { %1996 = shalt.err (!%p1993_p7)
}
 0xc29   :  { %s2029_s26 = smov 128   ;;  %s2030_s27 = smov 8  }
 0xc2a   :  { %1576 = dma.vmem_to_hbm [thread:$0]  %s1571_s23, 384, %s2531_s16, [#allocation3], %s2029_s26, %s2029_s26, %s2030_s27  }
 0xc2b   :  { %s1997_s30 = scalar_lea.vmem %s2472_s10, 384  ;;  %p2002_p9 = scmp.lt.s32.totalorder %s2472_s10, %s2472_s10 }
 0xc2c   :  { %p1998_p8 = scmp.ne.s32.totalorder %s2472_s10, %s1997_s30  ;;  %p2003_p10 = scmp.lt.s32.totalorder %s1997_s30, %s1997_s30 }
 0xc2e   :  { %p2004_p11 = por %p2003_p10, %p2002_p9 }
 0xc30   :  { %p2005_p12 = pnand %p2004_p11, %p1998_p8 }
 0xc32   :  { %2008 = shalt.err (!%p2005_p12)
}
 0xc33   :  { %s2009_s6 = scalar_lea.hbm %s2532_s17, 384 }
 0xc34   :  { %p2010_p13 = scmp.ne.s32.totalorder %s2532_s17, %s2009_s6  ;;  %p2013_p0 = scmp.lt.u32.totalorder %s2009_s6, %s2532_s17 }
 0xc36   :  { %p2015_p1 = pnand %p2013_p0, %p2010_p13 }
 0xc38   :  { %2018 = shalt.err (!%p2015_p1)
}
 0xc39   :  { %1588 = dma.vmem_to_hbm [thread:$0]  %s2472_s10, 384, %s2532_s17, [#allocation5], %s2029_s26, %s2029_s26, %s2030_s27  }
 0xc3a   :  { %v1646_v23 = vld [vmem:[%s2530_s15] ss:$0 sm:$0xff] }
 0xcec   :  { %v1542_v59 = vpop.f32.mrb[26].mxu0 }
 0xced   :  { %v1543_v60 = vadd.f32 %v1646_v23, %v1542_v59  ;;  %v1897_v61 = vpop.f32.mrb[27].mxu0 }
 0xcef   :  { %1562 = vst [vmem:[%s2533_s18] sm:$0xff] %v1543_v60 }
 0xcf0   :  { %v1547_v1 = vpop.f32.mrb[28].mxu0 }
 0xcf1   :  { %v1548_v3 = vadd.f32 %v1646_v23, %v1547_v1  ;;  %v1900_v4 = vpop.f32.mrb[29].mxu0 }
 0xcf3   :  { %1563 = vst [vmem:[%s2533_s18 + $0x8] sm:$0xff] %v1548_v3 }
 0xcf4   :  { %v1552_v5 = vpop.f32.mrb[30].mxu0 }
 0xcf5   :  { %v1553_v8 = vadd.f32 %v1646_v23, %v1552_v5  ;;  %v1903_v9 = vpop.f32.mrb[31].mxu0 }
 0xcf7   :  { %1564 = vst [vmem:[%s2533_s18 + $0x10] sm:$0xff] %v1553_v8 }
 0xcf8   :  { %2019 = dma.done.wait [#allocation3], 384  }
 0xcf9   :  { %2020 = vsyncadd [#allocation3], 4294966912 }
 0xcfa   :  { %2021 = dma.done.wait [#allocation5], 384  }
 0xcfb   :  { %2022 = vsyncadd [#allocation5], 4294966912 }
 0xcfc   :  { %1599 = vsyncpa [#allocation3], 1 }
 0xcfd   :  { %1600 = vsyncpa [#allocation5], 1 }

</bundles_post_ra>
